<compile_context>
chip_gen: v7x
topology: tpu7x:2x2x1
jax: 0.10.0
libtpu: 0.0.40
codegen_flags: <defaults>
</compile_context>

<pallas_src>
import functools

import jax
import jax.numpy as jnp
from jax.experimental import pallas as pl
from jax.experimental.pallas import tpu as pltpu


# ----------------------------------------------------------------------------
# Fused Pallas kernel: entire ProcessVGAE forward (eval mode), transposed layout
# ----------------------------------------------------------------------------
def _relu_rows(h, lo, hi):
    """relu only the sublane rows in [lo, hi); passthrough the rest (VPU select)."""
    row = jax.lax.broadcasted_iota(jnp.int32, h.shape, 0)
    mask = (row >= lo) & (row < hi)
    return jnp.where(mask, jnp.maximum(h, 0.0), h)


def _fused_vgae_kernel(at_ref, xt_ref,
                       w1_ref, b1_ref, w2_ref, b2_ref,
                       w3_ref, b3_ref, w4_ref, b4_ref,
                       edges_t_ref, nodes_t_ref,
                       *, d50, d70, nc):
    f32 = jnp.float32
    dot = lambda a, b: jnp.dot(a, b, preferred_element_type=f32)

    at = at_ref[...]           # A_norm^T           [N, N]
    xt = xt_ref[...]           # X^T                [nc, N]

    # ---- depth 1: shared aggregation of raw features --------------------
    ax_t = dot(xt, at)                                   # (A @ X)^T   [nc, N]
    # W1 = [W1e | W1n] stacked along cout -> one matmul, both paths, both relu
    h1 = jnp.maximum(dot(w1_ref[...], ax_t) + b1_ref[...], 0.0)   # [d30+nc, N]

    # ---- depth 2: one A pass over concatenated [e1 | n1] ----------------
    ah1 = dot(h1, at)                                    # (A @ [e1|n1])^T
    h2 = dot(w2_ref[...], ah1) + b2_ref[...]             # blockdiag(W2e, Wmn)
    h2 = _relu_rows(h2, 0, d50)                          # e2 relu, mu_node pass

    # ---- depth 3: one A pass over concatenated [e2 | mu_n] --------------
    ah2 = dot(h2, at)
    h3 = dot(w3_ref[...], ah2) + b3_ref[...]             # blockdiag(Wme, W5n)
    h3 = _relu_rows(h3, d70, d70 + nc)                   # mu_edge pass, nodes relu
    nodes_t_ref[...] = h3[d70:d70 + nc, :].astype(nodes_t_ref.dtype)

    # ---- depth 4: edge path only -----------------------------------------
    mu_e = h3[:d70, :]
    ah3 = dot(mu_e, at)
    edges = jax.nn.sigmoid(dot(w4_ref[...], ah3) + b4_ref[...])   # [ec, N]
    edges_t_ref[...] = edges.astype(edges_t_ref.dtype)


def process_vgae_forward(params, x, a_norm):
    """Eval-mode ProcessVGAE forward: returns (edges [N, ec], nodes [N, nc])."""
    n, nc = x.shape

    w1e, b1e = params["conv_1_edge"]
    w2e, b2e = params["conv_2_edge"]
    wme, bme = params["conv_mu_edge"]
    w4e, b4e = params["conv_4_edge"]
    w1n, b1n = params["conv1_node"]
    wmn, bmn = params["conv_mu_node"]
    w5n, b5n = params["conv5_node"]

    d30 = w1e.shape[1]
    d50 = w2e.shape[1]
    d70 = wme.shape[1]
    ec = w4e.shape[1]

    # --- layout plumbing / weight stacking done OUTSIDE the kernel (XLA) ----
    at = a_norm.T                                             # [N, N]
    xt = x.T                                                  # [nc, N]

    # depth 1: stacked weights for one matmul feeding both paths
    w1_t = jnp.concatenate([w1e, w1n], axis=1).T              # [d30+nc, nc]
    b1 = jnp.concatenate([b1e, b1n]).reshape(-1, 1)           # [d30+nc, 1]

    # depth 2: block-diag(conv_2_edge, conv_mu_node)
    w2 = jnp.zeros((d30 + nc, d50 + nc), jnp.float32)
    w2 = w2.at[:d30, :d50].set(w2e).at[d30:, d50:].set(wmn)
    w2_t = w2.T                                               # [d50+nc, d30+nc]
    b2 = jnp.concatenate([b2e, bmn]).reshape(-1, 1)

    # depth 3: block-diag(conv_mu_edge, conv5_node)
    w3 = jnp.zeros((d50 + nc, d70 + nc), jnp.float32)
    w3 = w3.at[:d50, :d70].set(wme).at[d50:, d70:].set(w5n)
    w3_t = w3.T                                               # [d70+nc, d50+nc]
    b3 = jnp.concatenate([bme, b5n]).reshape(-1, 1)

    # depth 4: edge head only
    w4_t = w4e.T                                              # [ec, d70]
    b4 = b4e.reshape(-1, 1)

    args = [at, xt, w1_t, b1, w2_t, b2, w3_t, b3, w4_t, b4]

    # Scoped-VMEM limit sized from the actual resident set (A_norm dominates);
    # clamp to v7x's 64 MiB physical VMEM so the same code runs everywhere.
    resident_elems = sum(int(a.size) for a in args)
    act_elems = n * ((d30 + nc) * 2 + (d50 + nc) * 2 + (d70 + nc) + d70 + ec + nc + nc)
    vmem_limit = int(min(64 * 1024 * 1024,
                         max(16 * 1024 * 1024, 8 * (resident_elems + act_elems))))

    kernel = functools.partial(_fused_vgae_kernel, d50=d50, d70=d70, nc=nc)
    vmem = pltpu.MemorySpace.VMEM

    edges_t, nodes_t = pl.pallas_call(
        kernel,
        out_shape=(
            jax.ShapeDtypeStruct((ec, n), jnp.float32),
            jax.ShapeDtypeStruct((nc, n), jnp.float32),
        ),
        in_specs=[pl.BlockSpec(a.shape, lambda: (0, 0), memory_space=vmem)
                  for a in args],
        out_specs=(
            pl.BlockSpec((ec, n), lambda: (0, 0), memory_space=vmem),
            pl.BlockSpec((nc, n), lambda: (0, 0), memory_space=vmem),
        ),
        compiler_params=pltpu.CompilerParams(vmem_limit_bytes=vmem_limit),
    )(*args)

    # lane-dense [C, N] kernel outputs -> module's [N, C] layout (cheap, in XLA)
    return edges_t.T, nodes_t.T


# ----------------------------------------------------------------------------
# Glue: dense GCN-normalized adjacency (matches PyG GCNConv gcn_norm).
# Note: duplicate parallel edges are counted with multiplicity by the dense
# scatter-add; this matches PyG only for deduplicated edge_index.
# ----------------------------------------------------------------------------
def build_norm_adj(edge_index, num_nodes):
    src = edge_index[0]
    dst = edge_index[1]
    a = jnp.zeros((num_nodes, num_nodes), jnp.float32)
    a = a.at[dst, src].add(1.0)                      # message flows source -> target
    # add_remaining_self_loops: add a unit self-loop only where none exists.
    idx = jnp.arange(num_nodes)
    diag = jnp.diagonal(a)
    a = a.at[idx, idx].set(jnp.where(diag > 0, diag, 1.0))
    deg = jnp.sum(a, axis=1)                         # in-degree incl. self loop
    dinv = jnp.where(deg > 0, 1.0 / jnp.sqrt(deg), 0.0)
    return dinv[:, None] * a * dinv[None, :]


# ----------------------------------------------------------------------------
# Parameter construction (deterministic, matches the module's layer shapes)
# ----------------------------------------------------------------------------
def make_params(key, node_channels, edge_channels):
    nc, ec = node_channels, edge_channels
    d30 = round(nc + (ec - nc) * 0.3)
    d50 = round(nc + (ec - nc) * 0.5)
    d70 = round(nc + (ec - nc) * 0.7)
    d60 = round(nc + (ec - nc) * 0.6)  # conv_3_edge: defined but unused in forward

    layer_shapes = {
        "conv_1_edge": (nc, d30),
        "conv_2_edge": (d30, d50),
        "conv_mu_edge": (d50, d70),
        "conv_logstd_edge": (d50, d70),   # unused in eval-mode forward
        "conv_3_edge": (d70, d60),        # unused in forward (kept for parity)
        "conv_4_edge": (d70, ec),
        "conv1_node": (nc, nc),
        "conv_mu_node": (nc, nc),
        "conv_logstd_node": (nc, nc),     # unused in eval-mode forward
        "conv5_node": (nc, nc),
    }
    params = {}
    for name, (cin, cout) in layer_shapes.items():
        key, kw = jax.random.split(key)
        scale = 1.0 / jnp.sqrt(jnp.float32(cin))
        w = jax.random.normal(kw, (cin, cout), jnp.float32) * scale
        b = jnp.zeros((cout,), jnp.float32)
        params[name] = (w, b)
    return params


# ----------------------------------------------------------------------------
if __name__ == "__main__":
    node_channels = 4
    edge_channels = 16
    num_nodes = 16
    num_edges = 32

    key = jax.random.PRNGKey(0)
    k_params, k_x, k_src, k_dst = jax.random.split(key, 4)

    params = make_params(k_params, node_channels, edge_channels)

    # Node feature matrix [N, node_channels]
    x = jax.random.normal(k_x, (num_nodes, node_channels), jnp.float32)

    # Random edge_index [2, E] (source row 0, target row 1)
    src = jax.random.randint(k_src, (num_edges,), 0, num_nodes)
    dst = jax.random.randint(k_dst, (num_edges,), 0, num_nodes)
    edge_index = jnp.stack([src, dst], axis=0).astype(jnp.int32)

    a_norm = build_norm_adj(edge_index, num_nodes)

    fwd = jax.jit(functools.partial(process_vgae_forward, params))
    edges, nodes = fwd(x, a_norm)
    jax.block_until_ready((edges, nodes))

    assert edges.shape == (num_nodes, edge_channels)
    assert nodes.shape == (num_nodes, node_channels)
    assert bool(jnp.all(jnp.isfinite(edges))) and bool(jnp.all(jnp.isfinite(nodes)))
    assert bool(jnp.all(edges >= 0.0)) and bool(jnp.all(edges <= 1.0))  # sigmoid output
    assert bool(jnp.all(nodes >= 0.0))                                   # relu output
    print("KERNEL_OK")
</pallas_src>

<mosaic_0001>
module attributes {stable_mosaic.version = 11 : i64} {
  func.func @_fused_vgae_kernel(%arg0: memref<16x16xf32, #tpu.memory_space<vmem>>, %arg1: memref<4x16xf32, #tpu.memory_space<vmem>>, %arg2: memref<12x4xf32, #tpu.memory_space<vmem>>, %arg3: memref<12x1xf32, #tpu.memory_space<vmem>>, %arg4: memref<14x12xf32, #tpu.memory_space<vmem>>, %arg5: memref<14x1xf32, #tpu.memory_space<vmem>>, %arg6: memref<16x14xf32, #tpu.memory_space<vmem>>, %arg7: memref<16x1xf32, #tpu.memory_space<vmem>>, %arg8: memref<16x12xf32, #tpu.memory_space<vmem>>, %arg9: memref<16x1xf32, #tpu.memory_space<vmem>>, %arg10: memref<16x16xf32, #tpu.memory_space<vmem>>, %arg11: memref<4x16xf32, #tpu.memory_space<vmem>>) attributes {dimension_semantics = [], scalar_prefetch = 0 : i64, scratch_operands = 0 : i64, tpu.core_type = #tpu.core_type<tc>} {
    %c0 = arith.constant 0 : index
    %c0_0 = arith.constant 0 : index
    %0 = vector.load %arg0[%c0, %c0_0] : memref<16x16xf32, #tpu.memory_space<vmem>>, vector<16x16xf32>
    %c0_1 = arith.constant 0 : index
    %c0_2 = arith.constant 0 : index
    %1 = vector.load %arg1[%c0_1, %c0_2] : memref<4x16xf32, #tpu.memory_space<vmem>>, vector<4x16xf32>
    %cst = arith.constant dense<0.000000e+00> : vector<4x16xf32>
    %2 = tpu.matmul %1, %0, %cst {dimension_numbers = #tpu.dot_dimension_numbers<[1], [0], [0], [1], [0, 0, 1, 1], [], []>} : vector<4x16xf32>, vector<16x16xf32>, vector<4x16xf32> -> vector<4x16xf32>
    %c0_3 = arith.constant 0 : index
    %c0_4 = arith.constant 0 : index
    %3 = vector.load %arg2[%c0_3, %c0_4] : memref<12x4xf32, #tpu.memory_space<vmem>>, vector<12x4xf32>
    %cst_5 = arith.constant dense<0.000000e+00> : vector<12x16xf32>
    %4 = tpu.matmul %3, %2, %cst_5 {dimension_numbers = #tpu.dot_dimension_numbers<[1], [0], [0], [1], [0, 0, 1, 1], [], []>} : vector<12x4xf32>, vector<4x16xf32>, vector<12x16xf32> -> vector<12x16xf32>
    %c0_6 = arith.constant 0 : index
    %c0_7 = arith.constant 0 : index
    %5 = vector.load %arg3[%c0_6, %c0_7] : memref<12x1xf32, #tpu.memory_space<vmem>>, vector<12x1xf32>
    %6 = vector.broadcast %5 : vector<12x1xf32> to vector<12x16xf32>
    %7 = arith.addf %4, %6 : vector<12x16xf32>
    %cst_8 = arith.constant 0.000000e+00 : f32
    %8 = vector.broadcast %cst_8 : f32 to vector<12x16xf32>
    %9 = arith.maximumf %7, %8 : vector<12x16xf32>
    %cst_9 = arith.constant dense<0.000000e+00> : vector<12x16xf32>
    %10 = tpu.matmul %9, %0, %cst_9 {dimension_numbers = #tpu.dot_dimension_numbers<[1], [0], [0], [1], [0, 0, 1, 1], [], []>} : vector<12x16xf32>, vector<16x16xf32>, vector<12x16xf32> -> vector<12x16xf32>
    %c0_10 = arith.constant 0 : index
    %c0_11 = arith.constant 0 : index
    %11 = vector.load %arg4[%c0_10, %c0_11] : memref<14x12xf32, #tpu.memory_space<vmem>>, vector<14x12xf32>
    %cst_12 = arith.constant dense<0.000000e+00> : vector<14x16xf32>
    %12 = tpu.matmul %11, %10, %cst_12 {dimension_numbers = #tpu.dot_dimension_numbers<[1], [0], [0], [1], [0, 0, 1, 1], [], []>} : vector<14x12xf32>, vector<12x16xf32>, vector<14x16xf32> -> vector<14x16xf32>
    %c0_13 = arith.constant 0 : index
    %c0_14 = arith.constant 0 : index
    %13 = vector.load %arg5[%c0_13, %c0_14] : memref<14x1xf32, #tpu.memory_space<vmem>>, vector<14x1xf32>
    %14 = vector.broadcast %13 : vector<14x1xf32> to vector<14x16xf32>
    %15 = arith.addf %12, %14 : vector<14x16xf32>
    %16 = tpu.iota {dimensions = array<i32: 0>} : vector<14x16xi32>
    %c0_i32 = arith.constant 0 : i32
    %17 = vector.broadcast %c0_i32 : i32 to vector<14x16xi32>
    %18 = arith.cmpi sge, %16, %17 : vector<14x16xi32>
    %c10_i32 = arith.constant 10 : i32
    %19 = vector.broadcast %c10_i32 : i32 to vector<14x16xi32>
    %20 = arith.cmpi slt, %16, %19 : vector<14x16xi32>
    %21 = arith.andi %18, %20 : vector<14x16xi1>
    %cst_15 = arith.constant 0.000000e+00 : f32
    %22 = vector.broadcast %cst_15 : f32 to vector<14x16xf32>
    %23 = arith.maximumf %15, %22 : vector<14x16xf32>
    %24 = arith.select %21, %23, %15 : vector<14x16xi1>, vector<14x16xf32>
    %cst_16 = arith.constant dense<0.000000e+00> : vector<14x16xf32>
    %25 = tpu.matmul %24, %0, %cst_16 {dimension_numbers = #tpu.dot_dimension_numbers<[1], [0], [0], [1], [0, 0, 1, 1], [], []>} : vector<14x16xf32>, vector<16x16xf32>, vector<14x16xf32> -> vector<14x16xf32>
    %c0_17 = arith.constant 0 : index
    %c0_18 = arith.constant 0 : index
    %26 = vector.load %arg6[%c0_17, %c0_18] : memref<16x14xf32, #tpu.memory_space<vmem>>, vector<16x14xf32>
    %cst_19 = arith.constant dense<0.000000e+00> : vector<16x16xf32>
    %27 = tpu.matmul %26, %25, %cst_19 {dimension_numbers = #tpu.dot_dimension_numbers<[1], [0], [0], [1], [0, 0, 1, 1], [], []>} : vector<16x14xf32>, vector<14x16xf32>, vector<16x16xf32> -> vector<16x16xf32>
    %c0_20 = arith.constant 0 : index
    %c0_21 = arith.constant 0 : index
    %28 = vector.load %arg7[%c0_20, %c0_21] : memref<16x1xf32, #tpu.memory_space<vmem>>, vector<16x1xf32>
    %29 = vector.broadcast %28 : vector<16x1xf32> to vector<16x16xf32>
    %30 = arith.addf %27, %29 : vector<16x16xf32>
    %31 = tpu.iota {dimensions = array<i32: 0>} : vector<16x16xi32>
    %c12_i32 = arith.constant 12 : i32
    %32 = vector.broadcast %c12_i32 : i32 to vector<16x16xi32>
    %33 = arith.cmpi sge, %31, %32 : vector<16x16xi32>
    %c16_i32 = arith.constant 16 : i32
    %34 = vector.broadcast %c16_i32 : i32 to vector<16x16xi32>
    %35 = arith.cmpi slt, %31, %34 : vector<16x16xi32>
    %36 = arith.andi %33, %35 : vector<16x16xi1>
    %cst_22 = arith.constant 0.000000e+00 : f32
    %37 = vector.broadcast %cst_22 : f32 to vector<16x16xf32>
    %38 = arith.maximumf %30, %37 : vector<16x16xf32>
    %39 = arith.select %36, %38, %30 : vector<16x16xi1>, vector<16x16xf32>
    %40 = vector.extract_strided_slice %39 {offsets = [12, 0], sizes = [4, 16], strides = [1, 1]} : vector<16x16xf32> to vector<4x16xf32>
    %c0_23 = arith.constant 0 : index
    %c0_24 = arith.constant 0 : index
    %41 = vector.load %arg11[%c0_23, %c0_24] : memref<4x16xf32, #tpu.memory_space<vmem>>, vector<4x16xf32>
    tpu.vector_store %arg11[%c0_23, %c0_24], %40 {strides = array<i32>} : memref<4x16xf32, #tpu.memory_space<vmem>>, vector<4x16xf32>,
    %42 = vector.extract_strided_slice %39 {offsets = [0, 0], sizes = [12, 16], strides = [1, 1]} : vector<16x16xf32> to vector<12x16xf32>
    %cst_25 = arith.constant dense<0.000000e+00> : vector<12x16xf32>
    %43 = tpu.matmul %42, %0, %cst_25 {dimension_numbers = #tpu.dot_dimension_numbers<[1], [0], [0], [1], [0, 0, 1, 1], [], []>} : vector<12x16xf32>, vector<16x16xf32>, vector<12x16xf32> -> vector<12x16xf32>
    %c0_26 = arith.constant 0 : index
    %c0_27 = arith.constant 0 : index
    %44 = vector.load %arg8[%c0_26, %c0_27] : memref<16x12xf32, #tpu.memory_space<vmem>>, vector<16x12xf32>
    %cst_28 = arith.constant dense<0.000000e+00> : vector<16x16xf32>
    %45 = tpu.matmul %44, %43, %cst_28 {dimension_numbers = #tpu.dot_dimension_numbers<[1], [0], [0], [1], [0, 0, 1, 1], [], []>} : vector<16x12xf32>, vector<12x16xf32>, vector<16x16xf32> -> vector<16x16xf32>
    %c0_29 = arith.constant 0 : index
    %c0_30 = arith.constant 0 : index
    %46 = vector.load %arg9[%c0_29, %c0_30] : memref<16x1xf32, #tpu.memory_space<vmem>>, vector<16x1xf32>
    %47 = vector.broadcast %46 : vector<16x1xf32> to vector<16x16xf32>
    %48 = arith.addf %45, %47 : vector<16x16xf32>
    %49 = arith.negf %48 : vector<16x16xf32>
    %50 = math.exp %49 : vector<16x16xf32>
    %cst_31 = arith.constant 1.000000e+00 : f32
    %51 = vector.broadcast %cst_31 : f32 to vector<16x16xf32>
    %52 = arith.addf %51, %50 : vector<16x16xf32>
    %53 = arith.divf %51, %52 : vector<16x16xf32>
    %c0_32 = arith.constant 0 : index
    %c0_33 = arith.constant 0 : index
    %54 = vector.load %arg10[%c0_32, %c0_33] : memref<16x16xf32, #tpu.memory_space<vmem>>, vector<16x16xf32>
    tpu.vector_store %arg10[%c0_32, %c0_33], %53 {strides = array<i32>} : memref<16x16xf32, #tpu.memory_space<vmem>>, vector<16x16xf32>,
    return
  }
}

</mosaic_0001>

<bundles_post_ra>
// kernel: process_vgae_forward.1
= control target key start
LH: loop header
LB: loop body
LE: loop exit
PB: predicated region body
PF: predicated region fallthrough
CT: control target
= control target key end

     0   :  { %v992_v2 = vmov 0.0|0.0   ;;  %vm993_vm0 = vmmov 0   ;;  %v994_v4 = vmov 0.0   ;;  %s1174_s0 = inlined_call_operand.vmem [shape: f32[16,16], index: 0, kind: input, shape index: {}]   ;;  %s1175_s1 = inlined_call_operand.vmem [shape: f32[4,16], index: 1, kind: input, shape index: {}]   ;;  %s1176_s2 = inlined_call_operand.vmem [shape: f32[12,4], index: 2, kind: input, shape index: {}]   ;;  %s1177_s3 = inlined_call_operand.vmem [shape: f32[12,1], index: 3, kind: input, shape index: {}]   ;;  %s1178_s4 = inlined_call_operand.vmem [shape: f32[14,12], index: 4, kind: input, shape index: {}]   ;;  %s1179_s5 = inlined_call_operand.vmem [shape: f32[14,1], index: 5, kind: input, shape index: {}]   ;;  %s1180_s6 = inlined_call_operand.vmem [shape: f32[16,14], index: 6, kind: input, shape index: {}]   ;;  %s1181_s7 = inlined_call_operand.vmem [shape: f32[16,1], index: 7, kind: input, shape index: {}, may-alias: {7,9}]   ;;  %s1182_s8 = inlined_call_operand.vmem [shape: f32[16,12], index: 8, kind: input, shape index: {}]   ;;  %s1183_s9 = inlined_call_operand.vmem [shape: f32[16,1], index: 9, kind: input, shape index: {}, may-alias: {7,9}]   ;;  %s1184_s10 = inlined_call_operand.vmem [shape: f32[16,16], index: 10, kind: output, shape index: {0}]   ;;  %s1185_s11 = inlined_call_operand.hbm [shape: f32[4,16], index: 11, kind: output, shape index: {1}]  }
   0x1   :  { %v38_v0 = vld [vmem:[%s1174_s0] sm:$0xff]  ;;  %v39_v1 = vld [vmem:[%s1174_s0 + $0x8] sm:$0xff]  ;;  %919 = vmatprep.subr.bf16.mxu0 %v992_v2  ;;  %869 = vmatprep.mubr.msk.f32.mxu0 %vm993_vm0, %v994_v4 }
   0x2   :  { %v1064_v3 = vpack.c.bf16 %v39_v1, %v38_v0 }
   0x3   :  { %17 = vsyncpa [#allocation3], 0  ;;  %v40_v5 = vld [vmem:[%s1175_s1] sm:$0xf]  ;;  %vm41_vm1 = vcmask 130048   ;;  %vm129_vm2 = vcmask 31744   ;;  %v397_v33 = vlaneseq }
   0x4   :  { %921 = vmatpush3.bf16.msra.mxu0 %v1064_v3  ;;  %v115_v6 = vld [vmem:[%s1176_s2] sm:$0xff]  ;;  %v995_v8 = vmov 0   ;;  %v118_v9 = vld [vmem:[%s1177_s3 + $0x8] sm:$0xf]  ;;  %vm136_vm3 = vcmask 1043456   ;;  %vm312_vm4 = vcmask 97280  }
   0x5   :  { %874 = vmatprep.mubr.msk.f32.mxu1 %vm129_vm2, %v115_v6  ;;  %v117_v7 = vld [vmem:[%s1177_s3] sm:$0xff]  ;;  %958 = vset.pattern.permute.xlu0 %v995_v8  ;;  %v494_v10 = vld [vmem:[%s1181_s7 + $0x8] sm:$0xff]  ;;  %vm996_vm5 = vmmov 1   ;;  %v398_v35 = vshrl.u32 %v397_v33, 7  ;;  %vm505_vm8 = vcmask 113664   ;;  %vm512_vm9 = vcmask 1045504  }
   0x6   :  { %959 = vset.pattern.permute.xlu1 %v995_v8  ;;  %121 = vperm.xlu0 %958, %v117_v7   ;;  %v686_v11 = vld [vmem:[%s1183_s9] sm:$0xff]  ;;  %v116_v13 = vld [vmem:[%s1176_s2 + $0x8] sm:$0xf]  ;;  %vm1118_vm6 = vmpackc.low %vm136_vm3, %vm996_vm5  ;;  %vm601_vm12 = vcmask 130052   ;;  %s997_s26 = smov [#allocation2]  }
   0x7   :  { %870 = vmatmul.mubr.msk.f32.vlgmr.msra.gmra.mrb[0].mxu0 %vm41_vm1, %v40_v5  ;;  %v298_v23 = vld [vmem:[%s1178_s4] sm:$0xff]  ;;  %v301_v25 = vld [vmem:[%s1179_s5 + $0x8] sm:$0x3f]  ;;  %v399_v36 = vadd.s32 8, %v398_v35  ;;  %vm937_vm10 = vmpackc.low %vm512_vm9, %vm996_vm5  ;;  %s804_s1 = sshll.u32 %s997_s26, 4  ;;  %s805_s1 = int_to_ptr.vmem [resolvable:$true] %s804_s1 }
   0x8   :  { %888 = vmatprep.mubr.msk.f32.mxu0 %vm312_vm4, %v298_v23  ;;  %v300_v24 = vld [vmem:[%s1179_s5] sm:$0xff]  ;;  %v687_v27 = vld [vmem:[%s1183_s9 + $0x8] sm:$0xff]  ;;  %s968_s27 = scalar_lea.vmem %s805_s1, 64  ;;  %p973_p1 = scmp.lt.s32.totalorder %s805_s1, %s805_s1 }
   0x9   :  { %304 = vperm.xlu1 %959, %v300_v24   ;;  %v493_v26 = vld [vmem:[%s1181_s7] sm:$0xff]  ;;  %v299_v32 = vld [vmem:[%s1178_s4 + $0x8] sm:$0x3f]  ;;  %vm403_vm7 = vcmp.lt.s32.totalorder %v399_v36, 10  ;;  %vm592_vm11 = vcmp.ge.s32.totalorder %v399_v36, 12  ;;  %p969_p0 = scmp.ne.s32.totalorder %s805_s1, %s968_s27  ;;  %p974_p2 = scmp.lt.s32.totalorder %s968_s27, %s968_s27 }
   0xa   :  { %126 = vperm.xlu0 %958, %v118_v9   ;;  %v491_v45 = vld [vmem:[%s1180_s6] sm:$0xff]  ;;  %v492_v49 = vld [vmem:[%s1180_s6 + $0x8] sm:$0xff] }
   0xb   :  { %v684_v58 = vld [vmem:[%s1182_s8] sm:$0xff]  ;;  %v685_v62 = vld [vmem:[%s1182_s8 + $0x8] sm:$0xff]  ;;  %p975_p3 = por %p974_p2, %p973_p1 }
   0xd   :  { %309 = vperm.xlu1 %959, %v301_v25   ;;  %p976_p4 = pnand %p975_p3, %p969_p0 }
   0xe   :  { %502 = vperm.xlu0 %958, %v494_v10  }
  0x11   :  { %497 = vperm.xlu1 %959, %v493_v26  }
  0x12   :  { %690 = vperm.xlu0 %958, %v686_v11  }
  0x15   :  { %695 = vperm.xlu1 %959, %v687_v27  }
  0x85   :  { %v122_v15 = vpop.permute.xlu0 %121 }
  0x88   :  { %v305_v34 = vpop.permute.xlu1 %304 }
  0x89   :  { %v127_v16 = vpop.permute.xlu0 %126 }
  0x8c   :  { %v310_v37 = vpop.permute.xlu1 %309 }
  0x8d   :  { %v503_v50 = vpop.permute.xlu0 %502 }
  0x90   :  { %v498_v52 = vpop.permute.xlu1 %497 }
  0xda   :  { %v111_v12 = vpop.f32.mrb[0].mxu0 }
  0xdb   :  { %v871_v14 = vpop.f32.mrb[1].mxu0  ;;  %872 = vmatprep.subr.msk.mxu1 %vm136_vm3, %v111_v12 }
  0xdc   :  { %873 = vmatpush3.msk.msra.mxu1 %vm136_vm3, %v111_v12 }
  0xdd   :  { %875 = vmatmul.mubr.msk.f32.vlgmr.msra.gmra.mrb[0].mxu1 %vm129_vm2, %v116_v13  ;;  %923 = vmatprep.subr.bf16.mxu1 %v1064_v3 }
  0xde   :  { %925 = vmatpush3.bf16.msra.mxu1 %v1064_v3 }
  0xdf   :  { %933 = vmatprep.subr.bf16.mxu1 %v1064_v3 }
 0x1b0   :  { %v876_v17 = vpop.f32.mrb[0].mxu1 }
 0x1b1   :  { %v212_v18 = vadd.f32 %v876_v17, %v127_v16  ;;  %v206_v19 = vpop.f32.mrb[1].mxu1 }
 0x1b2   :  { %v207_v20 = vadd.f32 %v206_v19, %v122_v15 }
 0x1b3   :  { %v216_v22 = vmax.f32 %v212_v18, 0.0 }
 0x1b4   :  { %v215_v21 = vmax.f32 %v207_v20, 0.0 }
 0x1b6   :  { %881 = vmatprep.mubr.msk.f32.mxu1 %vm41_vm1, %v215_v21 }
 0x1b7   :  { %882 = vmatmul.mubr.msk.f32.vlgmr.msra.gmra.mrb[2].mxu1 %vm41_vm1, %v216_v22 }
 0x1b8   :  { %935 = vmatpush3.bf16.msra.mxu1 %v1064_v3 }
 0x1b9   :  { %943 = vmatprep.subr.bf16.mxu1 %v1064_v3 }
 0x28a   :  { %v883_v28 = vpop.f32.mrb[2].mxu1 }
 0x28b   :  { %v289_v29 = vpop.f32.mrb[3].mxu1 }
 0x28c   :  { %v926_v31 = vpack.c.bf16 %v883_v28, %v289_v29 }
 0x28e   :  { %928 = vmatprep.subr.msk.bf16.mxu0 %vm1118_vm6, %v926_v31 }
 0x28f   :  { %931 = vmatpush3.bf16.msk.msra.mxu0 %vm1118_vm6, %v926_v31 }
 0x292   :  { %889 = vmatmul.mubr.msk.f32.vlgmr.msra.gmra.mrb[2].mxu0 %vm312_vm4, %v299_v32 }
 0x293   :  { %902 = vmatprep.mubr.msk.f32.mxu0 %vm505_vm8, %v491_v45 }
 0x365   :  { %v890_v38 = vpop.f32.mrb[2].mxu0 }
 0x366   :  { %v394_v39 = vadd.f32 %v890_v38, %v310_v37  ;;  %v388_v40 = vpop.f32.mrb[3].mxu0 }
 0x367   :  { %v389_v41 = vadd.f32 %v388_v40, %v305_v34 }
 0x368   :  { %v407_v42 = vmax.f32 %v394_v39, 0.0 }
 0x369   :  { %v406_v43 = vmax.f32 %v389_v41, 0.0 }
 0x36a   :  { %v409_v44 = vsel %vm403_vm7, %v407_v42, %v394_v39 }
 0x36b   :  { %895 = vmatprep.mubr.msk.f32.mxu1 %vm41_vm1, %v406_v43 }
 0x36c   :  { %896 = vmatmul.mubr.msk.f32.vlgmr.msra.gmra.mrb[4].mxu1 %vm41_vm1, %v409_v44 }
 0x36d   :  { %945 = vmatpush3.bf16.msra.mxu1 %v1064_v3 }
 0x43f   :  { %v897_v46 = vpop.f32.mrb[4].mxu1 }
 0x440   :  { %v482_v47 = vpop.f32.mrb[5].mxu1 }
 0x441   :  { %v936_v48 = vpack.c.bf16 %v897_v46, %v482_v47 }
 0x443   :  { %938 = vmatprep.subr.msk.bf16.mxu0 %vm937_vm10, %v936_v48 }
 0x444   :  { %941 = vmatpush3.bf16.msk.msra.mxu0 %vm937_vm10, %v936_v48 }
 0x447   :  { %903 = vmatmul.mubr.msk.f32.vlgmr.msra.gmra.mrb[4].mxu0 %vm505_vm8, %v492_v49 }
 0x448   :  { %916 = vmatprep.mubr.msk.f32.mxu0 %vm312_vm4, %v684_v58 }
 0x51a   :  { %v904_v51 = vpop.f32.mrb[4].mxu0 }
 0x51b   :  { %v588_v53 = vadd.f32 %v904_v51, %v503_v50  ;;  %v582_v54 = vpop.f32.mrb[5].mxu0 }
 0x51c   :  { %v583_v55 = vadd.f32 %v582_v54, %v498_v52 }
 0x51d   :  { %v598_v56 = vmax.f32 %v588_v53, 0.0 }
 0x51e   :  { %909 = vmatprep.mubr.msk.f32.mxu1 %vm41_vm1, %v583_v55 }
 0x51f   :  { %v600_v57 = vsel %vm592_vm11, %v598_v56, %v588_v53 }
 0x520   :  { %910 = vmatmul.mubr.msk.f32.vlgmr.msra.gmra.mrb[6].mxu1 %vm41_vm1, %v600_v57  ;;  %602 = vst.msk [vmem:[#allocation2 - $0x4] sm:$0xf0] %vm601_vm12, %v600_v57 }
 0x5f3   :  { %v911_v59 = vpop.f32.mrb[6].mxu1 }
 0x5f4   :  { %v675_v60 = vpop.f32.mrb[7].mxu1 }
 0x5f5   :  { %v946_v61 = vpack.c.bf16 %v911_v59, %v675_v60 }
 0x5f7   :  { %948 = vmatprep.subr.msk.bf16.mxu0 %vm1118_vm6, %v946_v61 }
 0x5f8   :  { %951 = vmatpush3.bf16.msk.msra.mxu0 %vm1118_vm6, %v946_v61 }
 0x5fb   :  { %917 = vmatmul.mubr.msk.f32.vlgmr.msra.gmra.mrb[6].mxu0 %vm312_vm4, %v685_v62 }
 0x5fc   :  { %979 = shalt.err (!%p976_p4)
}
 0x5fd   :  { %s980_s30 = scalar_lea.hbm %s1185_s11, 64 }
 0x5fe   :  { %p981_p5 = scmp.ne.s32.totalorder %s1185_s11, %s980_s30  ;;  %p984_p6 = scmp.lt.u32.totalorder %s980_s30, %s1185_s11 }
 0x600   :  { %p986_p7 = pnand %p984_p6, %p981_p5 }
 0x602   :  { %989 = shalt.err (!%p986_p7)
}
 0x603   :  { %807 = dma.vmem_to_hbm [thread:$0]  %s805_s1, 64, %s1185_s11, [#allocation3]   ;;  %v696_v63 = vpop.permute.xlu1 %695  ;;  %v691_v1 = vpop.permute.xlu0 %690 }
 0x6ce   :  { %v918_v0 = vpop.f32.mrb[6].mxu0 }
 0x6cf   :  { %v779_v2 = vadd.f32 %v918_v0, %v696_v63  ;;  %v773_v3 = vpop.f32.mrb[7].mxu0 }
 0x6d0   :  { %v774_v4 = vadd.f32 %v773_v3, %v691_v1 }
 0x6d1   :  { %v834_v5 = vmul.f32 -1.442695, %v779_v2 }
 0x6d2   :  { %v833_v6 = vmul.f32 -1.442695, %v774_v4 }
 0x6d3   :  { %960 = vpow2.f32 %v834_v5 }
 0x6d4   :  { %962 = vpow2.f32 %v833_v6 }
 0x6dd   :  { %v961_v7 = vpop.eup %960 }
 0x6de   :  { %v963_v8 = vpop.eup %962  ;;  %v789_v9 = vadd.f32 1.0, %v961_v7 }
 0x6df   :  { %v788_v10 = vadd.f32 1.0, %v963_v8 }
 0x6e0   :  { %964 = vrcp.f32 %v789_v9 }
 0x6e1   :  { %966 = vrcp.f32 %v788_v10 }
 0x6ea   :  { %v965_v11 = vpop.eup %964 }
 0x6eb   :  { %v967_v12 = vpop.eup %966  ;;  %795 = vst.msk [vmem:[%s1184_s10 + $0x8] sm:$0xff] %vm41_vm1, %v965_v11 }
 0x6ec   :  { %794 = vst.msk [vmem:[%s1184_s10] sm:$0xff] %vm41_vm1, %v967_v12 }
 0x6ed   :  { %990 = dma.done.wait [#allocation3], 64  }
 0x6ee   :  { %991 = vsyncadd [#allocation3], 4294967232 }
 0x6ef   :  { %813 = vsyncpa [#allocation3], 1 }

</bundles_post_ra>
